<compile_context>
chip_gen: v6e
topology: v6e:2x2x1
jax: 0.10.0
libtpu: 0.0.40
codegen_flags: <defaults>
</compile_context>

<pallas_src>
import jax
import jax.numpy as jnp
from jax.experimental import pallas as pl
from jax.experimental.pallas import tpu as pltpu

LANES = 128                                # lane dim of a vreg
ACC_ROWS = 64                              # accumulator rows (8 f32 vregs wide)
BLOCK_BYTES_PER_INPUT = 8 * 1024 * 1024    # ~8 MiB VMEM per input block
VMEM_LIMIT = 48 * 1024 * 1024              # fits v7x's 64 MiB physical VMEM
TINY_NUMEL = 1024                          # below this, plain XLA fusion wins


def _round_up(x: int, m: int) -> int:
    return ((x + m - 1) // m) * m


def _round_down(x: int, m: int) -> int:
    return (x // m) * m


def _hinge_ref(output, target):
    """Pure-JAX reference of the PyTorch forward (reduction='sum', weight=None)."""
    loss = jnp.maximum(
        1.0 - output.astype(jnp.float32) * target.astype(jnp.float32), 0.0)
    return jnp.sum(loss)


def _make_kernel(block_r: int, rows_valid: int, needs_mask: bool):
    folds = block_r // ACC_ROWS

    def _fold(x):
        # Fold (block_r, C) into the resident (ACC_ROWS, C) accumulator with
        # VPU adds only; 8 independent vreg chains -> good VALU utilization.
        if folds == 1:
            return x
        return jnp.sum(x.reshape(folds, ACC_ROWS, x.shape[-1]), axis=0)

    def kernel(pred_ref, tgt_ref, acc_ref):
        i = pl.program_id(0)

        @pl.when(i == 0)
        def _():
            acc_ref[...] = jnp.zeros_like(acc_ref)

        p = pred_ref[...].astype(jnp.float32)
        t = tgt_ref[...].astype(jnp.float32)
        loss = jnp.maximum(1.0 - p * t, 0.0)          # hinge, elementwise (VPU)

        if needs_mask:
            last = pl.num_programs(0) - 1

            # Steady-state tiles: no masking work at all.
            @pl.when(i < last)
            def _():
                acc_ref[...] += _fold(loss)

            # Ragged final tile: select (not multiply) so NaN/Inf garbage in
            # the out-of-bounds rows of the VMEM buffer cannot leak in.
            @pl.when(i == last)
            def _():
                n_valid = rows_valid - i * block_r
                row_ids = jax.lax.broadcasted_iota(jnp.int32, loss.shape, 0)
                acc_ref[...] += _fold(jnp.where(row_ids < n_valid, loss, 0.0))
        else:
            acc_ref[...] += _fold(loss)

    return kernel


def _launch(pred2d, tgt2d, block_bytes):
    """Run the hinge-sum kernel over a 2-D (rows, cols) view of both inputs."""
    rows, cols = pred2d.shape
    lane_cols = _round_up(cols, LANES)                  # VMEM-padded lane width
    itemsizes = pred2d.dtype.itemsize + tgt2d.dtype.itemsize
    bytes_per_row = lane_cols * itemsizes               # both inputs, per row

    budget_rows = max(ACC_ROWS, (2 * block_bytes) // bytes_per_row)
    if rows <= budget_rows:
        block_r = _round_up(rows, ACC_ROWS)             # single tile
    else:
        block_r = max(ACC_ROWS, _round_down(budget_rows, ACC_ROWS))

    num_tiles = pl.cdiv(rows, block_r)
    needs_mask = (rows % block_r) != 0

    kernel = _make_kernel(block_r, rows, needs_mask)

    partials = pl.pallas_call(
        kernel,
        out_shape=jax.ShapeDtypeStruct((ACC_ROWS, cols), jnp.float32),
        grid=(num_tiles,),
        in_specs=[
            pl.BlockSpec((block_r, cols), lambda i: (i, 0)),
            pl.BlockSpec((block_r, cols), lambda i: (i, 0)),
        ],
        out_specs=pl.BlockSpec((ACC_ROWS, cols), lambda i: (0, 0)),
        compiler_params=pltpu.CompilerParams(
            dimension_semantics=("arbitrary",),
            vmem_limit_bytes=VMEM_LIMIT,
        ),
    )(pred2d, tgt2d)

    # Tiny final cross-lane reduce (<= ACC_ROWS x cols f32) done by XLA.
    return jnp.sum(partials)


def hinge_loss_sum(output: jax.Array, target: jax.Array,
                   *, block_bytes: int = BLOCK_BYTES_PER_INPUT) -> jax.Array:
    """Pallas TPU implementation of HingeLoss(reduction='sum', weight=None)."""
    assert output.shape == target.shape, "output/target must have same shape"

    n = output.size
    if n == 0:
        return jnp.zeros((), jnp.float32)

    if n < TINY_NUMEL:
        # Kernel-launch + per-step overhead dominates; let XLA fuse it.
        return _hinge_ref(output, target)

    itemsizes = output.dtype.itemsize + target.dtype.itemsize

    if n % LANES == 0:
        # Free reshape (contiguous, total multiple of 128) to a lane-dense
        # (rows, 128) view.  No copies, no masking except a ragged last tile.
        rows = n // LANES
        return _launch(output.reshape(rows, LANES), target.reshape(rows, LANES),
                       block_bytes)

    # numel not 128-aligned: avoid a full-array pad copy by collapsing the
    # leading dims (free reshape) to (rows, last_dim) and row-masking the
    # ragged last tile in-kernel.  Only taken when the trailing dim keeps lane
    # utilization >= 50% and the minimal (64, last_dim) block fits VMEM.
    if output.ndim >= 2:
        last = output.shape[-1]
        lane_cols = _round_up(last, LANES)
        lane_ok = lane_cols <= 2 * last
        vmem_ok = 2 * ACC_ROWS * lane_cols * itemsizes <= VMEM_LIMIT // 2
        if lane_ok and vmem_ok:
            rows = n // last
            return _launch(output.reshape(rows, last),
                           target.reshape(rows, last), block_bytes)

    # TODO(synk): exotic unaligned shapes (1-D, tiny or huge trailing dim)
    # still pad the flat array to a 128-multiple (full copy).  Pad value 1 for
    # both sides -> hinge contribution relu(1 - 1*1) = 0.
    pad = (-n) % LANES
    pred = jnp.pad(output.reshape(-1), (0, pad), constant_values=1)
    tgt = jnp.pad(target.reshape(-1), (0, pad), constant_values=1)
    rows = (n + pad) // LANES
    return _launch(pred.reshape(rows, LANES), tgt.reshape(rows, LANES),
                   block_bytes)


if __name__ == "__main__":
    key = jax.random.PRNGKey(0)
    ks = jax.random.split(key, 10)

    def labels(k, shape, dtype):
        return jnp.where(jax.random.uniform(k, shape) > 0.5, 1.0, -1.0).astype(dtype)

    cases = []

    # A: f32, 128-aligned numel -> lane-dense flat path.
    shp = (2, 4, 16, 16)
    cases.append((jax.random.normal(ks[0], shp, jnp.float32),
                  labels(ks[1], shp, jnp.float32), {}))

    # B: bf16, unaligned numel, last dim >= 64 -> copy-free (rows, last_dim)
    #    path with in-kernel ragged-row masking.
    shp = (5, 3, 70)
    cases.append((jax.random.normal(ks[2], shp, jnp.float32).astype(jnp.bfloat16),
                  labels(ks[3], shp, jnp.bfloat16), {}))

    # C: f32, unaligned numel with tiny last dim -> padded fallback path.
    shp = (3, 70, 11)
    cases.append((jax.random.normal(ks[4], shp, jnp.float32),
                  labels(ks[5], shp, jnp.float32), {}))

    # D: tiny input -> plain-XLA fast path (no kernel launch).
    shp = (2, 7)
    cases.append((jax.random.normal(ks[6], shp, jnp.float32),
                  labels(ks[7], shp, jnp.float32), {}))

    # E: small block budget to force a multi-tile grid + gated last-tile mask.
    shp = (130, 128)
    cases.append((jax.random.normal(ks[8], shp, jnp.float32),
                  labels(ks[9], shp, jnp.float32), {"block_bytes": 32 * 1024}))

    for idx, (o, t, kw) in enumerate(cases):
        got = jax.block_until_ready(hinge_loss_sum(o, t, **kw))
        want = jax.block_until_ready(_hinge_ref(o, t))
        assert jnp.allclose(got, want, rtol=1e-5, atol=1e-3), (idx, got, want)

    print("KERNEL_OK")
</pallas_src>

<mosaic_0001>
module attributes {stable_mosaic.version = 11 : i64} {
  func.func @kernel(%arg0: i32, %arg1: memref<64x128xf32, #tpu.memory_space<vmem>>, %arg2: memref<64x128xf32, #tpu.memory_space<vmem>>, %arg3: memref<64x128xf32, #tpu.memory_space<vmem>>) attributes {dimension_semantics = [#tpu.dimension_semantics<arbitrary>], iteration_bounds = array<i64: 1>, scalar_prefetch = 0 : i64, scratch_operands = 0 : i64, tpu.core_type = #tpu.core_type<tc>, window_params = [{transform_indices = @transform_0, window_bounds = array<i64: 64, 128>}, {transform_indices = @transform_1, window_bounds = array<i64: 64, 128>}, {pipeline_mode = #tpu.pipeline_mode<synchronous>, transform_indices = @transform_2, window_bounds = array<i64: 64, 128>}]} {
    %c0_i32 = arith.constant 0 : i32
    %0 = arith.cmpi eq, %arg0, %c0_i32 : i32
    %1 = arith.extui %0 : i1 to i32
    %c0_i32_0 = arith.constant 0 : i32
    %2 = arith.cmpi ne, %1, %c0_i32_0 : i32
    scf.if %2 {
      %cst_9 = arith.constant 0.000000e+00 : f32
      %16 = vector.broadcast %cst_9 : f32 to vector<64x128xf32>
      %c0_10 = arith.constant 0 : index
      %c0_11 = arith.constant 0 : index
      %17 = vector.load %arg3[%c0_10, %c0_11] : memref<64x128xf32, #tpu.memory_space<vmem>>, vector<64x128xf32>
      tpu.vector_store %arg3[%c0_10, %c0_11], %16 {strides = array<i32>} : memref<64x128xf32, #tpu.memory_space<vmem>>, vector<64x128xf32>,
    } else {
    }
    %c0 = arith.constant 0 : index
    %c0_1 = arith.constant 0 : index
    %3 = vector.load %arg1[%c0, %c0_1] : memref<64x128xf32, #tpu.memory_space<vmem>>, vector<64x128xf32>
    %c0_2 = arith.constant 0 : index
    %c0_3 = arith.constant 0 : index
    %4 = vector.load %arg2[%c0_2, %c0_3] : memref<64x128xf32, #tpu.memory_space<vmem>>, vector<64x128xf32>
    %5 = arith.mulf %3, %4 : vector<64x128xf32>
    %cst = arith.constant 1.000000e+00 : f32
    %6 = vector.broadcast %cst : f32 to vector<64x128xf32>
    %7 = arith.subf %6, %5 : vector<64x128xf32>
    %cst_4 = arith.constant 0.000000e+00 : f32
    %8 = vector.broadcast %cst_4 : f32 to vector<64x128xf32>
    %9 = arith.maximumf %7, %8 : vector<64x128xf32>
    %c0_i32_5 = arith.constant 0 : i32
    %10 = arith.cmpi slt, %arg0, %c0_i32_5 : i32
    %11 = arith.extui %10 : i1 to i32
    %c0_i32_6 = arith.constant 0 : i32
    %12 = arith.cmpi ne, %11, %c0_i32_6 : i32
    scf.if %12 {
      %c0_9 = arith.constant 0 : index
      %c0_10 = arith.constant 0 : index
      %16 = vector.load %arg3[%c0_9, %c0_10] : memref<64x128xf32, #tpu.memory_space<vmem>>, vector<64x128xf32>
      %17 = arith.addf %16, %9 : vector<64x128xf32>
      %c0_11 = arith.constant 0 : index
      %c0_12 = arith.constant 0 : index
      %18 = vector.load %arg3[%c0_11, %c0_12] : memref<64x128xf32, #tpu.memory_space<vmem>>, vector<64x128xf32>
      tpu.vector_store %arg3[%c0_11, %c0_12], %17 {strides = array<i32>} : memref<64x128xf32, #tpu.memory_space<vmem>>, vector<64x128xf32>,
    } else {
    }
    %c0_i32_7 = arith.constant 0 : i32
    %13 = arith.cmpi eq, %arg0, %c0_i32_7 : i32
    %14 = arith.extui %13 : i1 to i32
    %c0_i32_8 = arith.constant 0 : i32
    %15 = arith.cmpi ne, %14, %c0_i32_8 : i32
    scf.if %15 {
      %c64_i32 = arith.constant 64 : i32
      %16 = arith.muli %arg0, %c64_i32 : i32
      %c16_i32 = arith.constant 16 : i32
      %17 = arith.subi %c16_i32, %16 : i32
      %18 = tpu.iota {dimensions = array<i32: 0>} : vector<64x128xi32>
      %c0_9 = arith.constant 0 : index
      %c0_10 = arith.constant 0 : index
      %19 = vector.load %arg3[%c0_9, %c0_10] : memref<64x128xf32, #tpu.memory_space<vmem>>, vector<64x128xf32>
      %20 = vector.broadcast %17 : i32 to vector<64x128xi32>
      %21 = arith.cmpi slt, %18, %20 : vector<64x128xi32>
      %cst_11 = arith.constant 0.000000e+00 : f32
      %22 = vector.broadcast %cst_11 : f32 to vector<64x128xf32>
      %23 = arith.select %21, %9, %22 : vector<64x128xi1>, vector<64x128xf32>
      %24 = arith.addf %19, %23 : vector<64x128xf32>
      %c0_12 = arith.constant 0 : index
      %c0_13 = arith.constant 0 : index
      %25 = vector.load %arg3[%c0_12, %c0_13] : memref<64x128xf32, #tpu.memory_space<vmem>>, vector<64x128xf32>
      tpu.vector_store %arg3[%c0_12, %c0_13], %24 {strides = array<i32>} : memref<64x128xf32, #tpu.memory_space<vmem>>, vector<64x128xf32>,
    } else {
    }
    return
  }
  func.func @transform_0(%arg0: i32) -> (i32, i32) {
    %c0_i32 = arith.constant 0 : i32
    %c0_i32_0 = arith.constant 0 : i32
    return %arg0, %c0_i32 : i32, i32
  }
  func.func @transform_1(%arg0: i32) -> (i32, i32) {
    %c0_i32 = arith.constant 0 : i32
    %c0_i32_0 = arith.constant 0 : i32
    return %arg0, %c0_i32 : i32, i32
  }
  func.func @transform_2(%arg0: i32) -> (i32, i32) {
    %c0_i32 = arith.constant 0 : i32
    %c0_i32_0 = arith.constant 0 : i32
    %c0_i32_1 = arith.constant 0 : i32
    return %c0_i32, %c0_i32_0 : i32, i32
  }
}

</mosaic_0001>

<bundles_post_ra>
// kernel: tpu_custom_call.1
= control target key start
LH: loop header
LB: loop body
LE: loop exit
PB: predicated region body
PF: predicated region fallthrough
CT: control target
= control target key end

     0   :  { %7 = vsyncpa [#allocation3], 0  ;;  %s304_s0 = inlined_call_operand.hbm [shape: f32[16,128], index: 0, kind: input, shape index: {}]   ;;  %s305_s1 = inlined_call_operand.hbm [shape: f32[16,128], index: 1, kind: input, shape index: {}]   ;;  %s306_s2 = inlined_call_operand.hbm [shape: f32[64,128], index: 2, kind: output, shape index: {}]  }
   0x1   :  { %8 = vsyncpa [#allocation6], 0 }
   0x2   :  { %9 = vsyncpa [#allocation4], 0 }
   0x3   :  { %14 = vsyncadd [#allocation3], 768  ;;  %s265_s9 = smov [#allocation2]  }
   0x4   :  { %s15_s10 = sshll.u32 %s265_s9, 4  ;;  %s16_s10 = int_to_ptr.vmem [resolvable:$true] %s15_s10 }
   0x5   :  { %s207_s11 = scalar_lea.vmem %s16_s10, 256  ;;  %s211_s12 = scalar_lea.vmem %s16_s10, 1024 }
   0x6   :  { %p208_p0 = scmp.ne.s32.totalorder %s16_s10, %s207_s11  ;;  %p212_p1 = scmp.lt.s32.totalorder %s16_s10, %s16_s10 }
   0x7   :  { %p213_p2 = scmp.lt.s32.totalorder %s211_s12, %s207_s11 }
   0x9   :  { %p214_p3 = por %p213_p2, %p212_p1 }
   0xb   :  { %p215_p4 = pnand %p214_p3, %p208_p0 }
   0xd   :  { %218 = shalt.err (!%p215_p4)
}
   0xe   :  { %s266_s13 = smov 128   ;;  %s267_s14 = smov 8  }
   0xf   :  { %21 = dma.hbm_to_vmem [thread:$0]  %s304_s0, 256, %s16_s10, [#allocation3], %s266_s13, %s266_s13, %s267_s14  }
  0x10   :  { %26 = vsyncadd [#allocation6], 768  ;;  %s268_s17 = smov [#allocation5]  }
  0x11   :  { %s27_s18 = sshll.u32 %s268_s17, 4  ;;  %s28_s18 = int_to_ptr.vmem [resolvable:$true] %s27_s18 }
  0x12   :  { %s227_s19 = scalar_lea.vmem %s28_s18, 256  ;;  %s231_s20 = scalar_lea.vmem %s28_s18, 1024 }
  0x13   :  { %p228_p5 = scmp.ne.s32.totalorder %s28_s18, %s227_s19  ;;  %p232_p6 = scmp.lt.s32.totalorder %s28_s18, %s28_s18 }
  0x14   :  { %p233_p7 = scmp.lt.s32.totalorder %s231_s20, %s227_s19 }
  0x16   :  { %p234_p8 = por %p233_p7, %p232_p6 }
  0x18   :  { %p235_p9 = pnand %p234_p8, %p228_p5 }
  0x1a   :  { %238 = shalt.err (!%p235_p9)
}
  0x1b   :  { %33 = dma.hbm_to_vmem [thread:$0]  %s305_s1, 256, %s28_s18, [#allocation6], %s266_s13, %s266_s13, %s267_s14  }
  0x1c   :  { %259 = dma.done.wait [#allocation3], 1024  }
  0x1d   :  { %260 = vsyncadd [#allocation3], 4294966272 }
  0x1e   :  { %261 = dma.done.wait [#allocation6], 1024  }
  0x1f   :  { %262 = vsyncadd [#allocation6], 4294966272  ;;  %v269_v0 = vmov 0.0   ;;  %v52_v1 = vld [vmem:[#allocation2] sm:$0xff]  ;;  %v53_v3 = vld [vmem:[#allocation2 + $0x8] sm:$0xff]  ;;  %s270_s0 = smov [#allocation7]  }
  0x20   :  { %169 = vst [vmem:[#allocation7 + $0x10] sm:$0xff] %v269_v0  ;;  %170 = vst [vmem:[#allocation7 + $0x18] sm:$0xff] %v269_v0  ;;  %v60_v2 = vld [vmem:[#allocation5] sm:$0xff]  ;;  %v61_v5 = vld [vmem:[#allocation5 + $0x8] sm:$0xff]  ;;  %s180_s1 = sshll.u32 %s270_s0, 4  ;;  %s181_s1 = int_to_ptr.vmem [resolvable:$true] %s180_s1 }
  0x21   :  { %171 = vst [vmem:[#allocation7 + $0x20] sm:$0xff] %v269_v0  ;;  %172 = vst [vmem:[#allocation7 + $0x28] sm:$0xff] %v269_v0  ;;  %v68_v4 = vmul.f32 %v60_v2, %v52_v1  ;;  %v69_v6 = vmul.f32 %v61_v5, %v53_v3  ;;  %s239_s23 = scalar_lea.vmem %s181_s1, 1024  ;;  %p244_p11 = scmp.lt.s32.totalorder %s181_s1, %s181_s1 }
  0x22   :  { %173 = vst [vmem:[#allocation7 + $0x30] sm:$0xff] %v269_v0  ;;  %174 = vst [vmem:[#allocation7 + $0x38] sm:$0xff] %v269_v0  ;;  %p240_p10 = scmp.ne.s32.totalorder %s181_s1, %s239_s23  ;;  %p245_p12 = scmp.lt.s32.totalorder %s239_s23, %s239_s23 }
  0x23   :  { %v76_v7 = vsub.f32 1.0, %v68_v4  ;;  %v77_v8 = vsub.f32 1.0, %v69_v6 }
  0x24   :  { %p246_p13 = por %p245_p12, %p244_p11 }
  0x25   :  { %v84_v9 = vmax.f32 %v76_v7, 0.0  ;;  %v85_v10 = vmax.f32 %v77_v8, 0.0 }
  0x26   :  { %p247_p0 = pnand %p246_p13, %p240_p10 }
  0x27   :  { %167 = vst [vmem:[#allocation7] sm:$0xff] %v84_v9  ;;  %168 = vst [vmem:[#allocation7 + $0x8] sm:$0xff] %v85_v10 }
  0x28   :  { %250 = shalt.err (!%p247_p0)
}
  0x29   :  { %186 = dma.vmem_to_hbm [thread:$0]  %s181_s1, 1024, %s306_s2, [#allocation4], %s266_s13, %s266_s13, %s267_s14  }
  0x2a   :  { %263 = dma.done.wait [#allocation4], 1024  }
  0x2b   :  { %264 = vsyncadd [#allocation4], 4294966272 }
  0x2c   :  { %190 = vsyncpa [#allocation3], 1 }
  0x2d   :  { %191 = vsyncpa [#allocation6], 1 }
  0x2e   :  { %192 = vsyncpa [#allocation4], 1 }

</bundles_post_ra>
